<compile_context>
chip_gen: v6e
topology: v6e:2x2x1
jax: 0.10.0
libtpu: 0.0.40
codegen_flags: <defaults>
</compile_context>

<pallas_src>
import math
import numpy as np

import jax
import jax.numpy as jnp
from jax import lax
from jax.experimental import pallas as pl
from jax.experimental.pallas import tpu as pltpu

KS = 31      # gaussian kernel size
PAD = KS // 2


def _get_kernel(kernlen=31, nsig=4):
    """Deterministic gaussian kernel, identical to the PyTorch _get_kernel."""
    interval = (2 * nsig + 1.0) / kernlen
    x = np.linspace(-nsig - interval / 2.0, nsig + interval / 2.0, kernlen + 1)
    cdf = np.array([0.5 * (1.0 + math.erf(v / math.sqrt(2.0))) for v in x])
    kern1d = np.diff(cdf)
    kernel_raw = np.sqrt(np.outer(kern1d, kern1d))
    kernel = kernel_raw / kernel_raw.sum()
    return kernel.astype(np.float32)


def _band_matrices(gaussian_kernel, H, W):
    """Host-side: factor the separable gaussian and absorb the zero padding
    into banded Toeplitz matrices so that
        conv2d(att, g, padding=PAD)  ==  R @ att @ C          (R: HxH, C: WxW)
    g = sqrt(outer(k1d,k1d))/sum = outer(t, t) exactly, with t = sqrt(diag(g))."""
    g = np.asarray(gaussian_kernel, dtype=np.float64)
    t = np.sqrt(np.diagonal(g))                     # exact 1-D factor
    K = t.shape[0]
    P = K // 2
    R = np.zeros((H, H), np.float64)
    for i in range(H):
        for u in range(K):
            ip = i + u - P
            if 0 <= ip < H:
                R[i, ip] = t[u]
    Cm = np.zeros((W, W), np.float64)
    for j in range(W):
        for v in range(K):
            jp = j + v - P
            if 0 <= jp < W:
                Cm[jp, j] = t[v]
    return R.astype(np.float32), Cm.astype(np.float32)


def sa_kernel(r_ref, c_ref, att_ref, x_ref, out_ref, m_ref):
    # Per-grid-step block shapes:
    #   r_ref:   (H, H)          VMEM, row band matrix (constant over grid)
    #   c_ref:   (W, W)          VMEM, column band matrix (constant over grid)
    #   att_ref: (1, 1, H, W)    VMEM, raw attention map for this batch elem
    #   x_ref:   (1, Cb, H, W)   VMEM
    #   out_ref: (1, Cb, H, W)   VMEM
    #   m_ref:   (H, W) f32      VMEM scratch: max(norm(soft), att), cached
    #                            across the C-tile grid axis (depends on b only)
    @pl.when(pl.program_id(1) == 0)
    def _():
        att = att_ref[0, 0]                                         # (H, W)
        # Separable 31x31 "same" conv with zero padding == two MXU matmuls.
        soft = jnp.dot(
            r_ref[...],
            jnp.dot(att, c_ref[...], preferred_element_type=jnp.float32),
            preferred_element_type=jnp.float32)                     # (H, W)
        # min_max_norm over the spatial dims (single channel per batch elem).
        mx = jnp.max(soft, keepdims=True)                           # (1, 1)
        mn = jnp.min(soft, keepdims=True)                           # (1, 1)
        inv = pl.reciprocal(mx - mn + 1e-8, approx=False)
        soft = (soft - mn) * inv
        m_ref[...] = jnp.maximum(soft, att)                         # (H, W)

    # Scale x by the cached soft/hard attention map (broadcast over C).
    out_ref[...] = x_ref[...] * m_ref[...][None, None, :, :]


def sa_forward(attention, x, gaussian_kernel, *, c_block=None):
    """attention: (B, 1, H, W) f32, x: (B, C, H, W) f32, gaussian_kernel: (31, 31) f32."""
    B, C, H, W = x.shape
    assert attention.shape == (B, 1, H, W)

    R, Cm = _band_matrices(gaussian_kernel, H, W)

    if c_block is None:
        # Keep each x/out block <= ~8 MiB so double-buffered in+out stays well
        # under the scoped VMEM limit (also fits v7x's 64 MiB VMEM).
        per_c_bytes = H * W * x.dtype.itemsize
        c_block = max(1, min(C, (8 * 1024 * 1024) // max(per_c_bytes, 1)))
        while C % c_block:
            c_block -= 1

    grid = (B, C // c_block)

    return pl.pallas_call(
        sa_kernel,
        out_shape=jax.ShapeDtypeStruct((B, C, H, W), x.dtype),
        grid_spec=pltpu.PrefetchScalarGridSpec(
            num_scalar_prefetch=0,
            grid=grid,
            in_specs=[
                pl.BlockSpec((H, H), lambda b, c: (0, 0)),                  # R band
                pl.BlockSpec((W, W), lambda b, c: (0, 0)),                  # C band
                pl.BlockSpec((1, 1, H, W), lambda b, c: (b, 0, 0, 0)),      # attention
                pl.BlockSpec((1, c_block, H, W), lambda b, c: (b, c, 0, 0)),  # x
            ],
            out_specs=pl.BlockSpec((1, c_block, H, W), lambda b, c: (b, c, 0, 0)),
            scratch_shapes=[pltpu.VMEM((H, W), jnp.float32)],
        ),
        compiler_params=pltpu.CompilerParams(
            dimension_semantics=("parallel", "arbitrary"),
            vmem_limit_bytes=48 * 1024 * 1024,
        ),
    )(jnp.asarray(R), jnp.asarray(Cm), attention, x)


def sa_reference(attention, x, gaussian_kernel):
    """Pure-JAX reference mirroring the PyTorch forward."""
    soft = lax.conv_general_dilated(
        attention, gaussian_kernel[None, None], (1, 1),
        [(PAD, PAD), (PAD, PAD)],
        dimension_numbers=("NCHW", "OIHW", "NCHW"),
        precision=lax.Precision.HIGHEST)
    mx = soft.max(axis=(2, 3), keepdims=True)
    mn = soft.min(axis=(2, 3), keepdims=True)
    soft = (soft - mn) / (mx - mn + 1e-8)
    return x * jnp.maximum(soft, attention)


if __name__ == "__main__":
    B, C, H, W = 2, 4, 16, 16

    key = jax.random.PRNGKey(0)
    k_att, k_x = jax.random.split(key)
    attention = jax.random.uniform(k_att, (B, 1, H, W), dtype=jnp.float32)
    x = jax.random.normal(k_x, (B, C, H, W), dtype=jnp.float32)
    g = jnp.asarray(_get_kernel(KS, 4))  # deterministic parameter init

    out = sa_forward(attention, x, g)
    out = jax.block_until_ready(out)

    ref = jax.block_until_ready(sa_reference(attention, x, g))
    np.testing.assert_allclose(np.asarray(out), np.asarray(ref), rtol=1e-3, atol=1e-5)

    print("KERNEL_OK")
</pallas_src>

<mosaic_0001>
module attributes {stable_mosaic.version = 11 : i64} {
  func.func @sa_kernel(%arg0: i32, %arg1: i32, %arg2: memref<16x16xf32, #tpu.memory_space<vmem>>, %arg3: memref<16x16xf32, #tpu.memory_space<vmem>>, %arg4: memref<1x1x16x16xf32, #tpu.memory_space<vmem>>, %arg5: memref<1x4x16x16xf32, #tpu.memory_space<vmem>>, %arg6: memref<1x4x16x16xf32, #tpu.memory_space<vmem>>, %arg7: memref<16x16xf32, #tpu.memory_space<vmem>>) attributes {dimension_semantics = [#tpu.dimension_semantics<parallel>, #tpu.dimension_semantics<arbitrary>], iteration_bounds = array<i64: 2, 1>, scalar_prefetch = 0 : i64, scratch_operands = 1 : i64, tpu.core_type = #tpu.core_type<tc>, window_params = [{pipeline_mode = #tpu.pipeline_mode<synchronous>, transform_indices = @transform_0, window_bounds = array<i64: 16, 16>}, {pipeline_mode = #tpu.pipeline_mode<synchronous>, transform_indices = @transform_1, window_bounds = array<i64: 16, 16>}, {transform_indices = @transform_2, window_bounds = array<i64: 1, 1, 16, 16>}, {transform_indices = @transform_3, window_bounds = array<i64: 1, 4, 16, 16>}, {transform_indices = @transform_4, window_bounds = array<i64: 1, 4, 16, 16>}]} {
    %c0_i32 = arith.constant 0 : i32
    %0 = arith.cmpi eq, %arg1, %c0_i32 : i32
    %1 = arith.extui %0 : i1 to i32
    %c0_i32_0 = arith.constant 0 : i32
    %2 = arith.cmpi ne, %1, %c0_i32_0 : i32
    scf.if %2 {
      %c0_10 = arith.constant 0 : index
      %c0_11 = arith.constant 0 : index
      %c0_12 = arith.constant 0 : index
      %c0_13 = arith.constant 0 : index
      %9 = vector.load %arg4[%c0_10, %c0_11, %c0_12, %c0_13] : memref<1x1x16x16xf32, #tpu.memory_space<vmem>>, vector<1x1x16x16xf32>
      %10 = vector.shape_cast %9 : vector<1x1x16x16xf32> to vector<16x16xf32>
      %c0_14 = arith.constant 0 : index
      %c0_15 = arith.constant 0 : index
      %11 = vector.load %arg2[%c0_14, %c0_15] : memref<16x16xf32, #tpu.memory_space<vmem>>, vector<16x16xf32>
      %c0_16 = arith.constant 0 : index
      %c0_17 = arith.constant 0 : index
      %12 = vector.load %arg3[%c0_16, %c0_17] : memref<16x16xf32, #tpu.memory_space<vmem>>, vector<16x16xf32>
      %cst = arith.constant dense<0.000000e+00> : vector<16x16xf32>
      %13 = tpu.matmul %10, %12, %cst {dimension_numbers = #tpu.dot_dimension_numbers<[1], [0], [0], [1], [0, 0, 1, 1], [], []>} : vector<16x16xf32>, vector<16x16xf32>, vector<16x16xf32> -> vector<16x16xf32>
      %cst_18 = arith.constant dense<0.000000e+00> : vector<16x16xf32>
      %14 = tpu.matmul %11, %13, %cst_18 {dimension_numbers = #tpu.dot_dimension_numbers<[1], [0], [0], [1], [0, 0, 1, 1], [], []>} : vector<16x16xf32>, vector<16x16xf32>, vector<16x16xf32> -> vector<16x16xf32>
      %15 = vector.shape_cast %14 : vector<16x16xf32> to vector<1x16x16xf32>
      %cst_19 = arith.constant dense<0xFF800000> : vector<1xf32>
      %16 = vector.multi_reduction <maximumf>, %15, %cst_19 [1, 2] : vector<1x16x16xf32> to vector<1xf32>
      %17 = vector.shape_cast %16 : vector<1xf32> to vector<1x1x1xf32>
      %18 = vector.extract %17[0, 0, 0] : f32 from vector<1x1x1xf32>
      %19 = vector.broadcast %18 : f32 to vector<1x1xf32>
      %20 = vector.shape_cast %14 : vector<16x16xf32> to vector<1x16x16xf32>
      %cst_20 = arith.constant dense<0x7F800000> : vector<1xf32>
      %21 = vector.multi_reduction <minimumf>, %20, %cst_20 [1, 2] : vector<1x16x16xf32> to vector<1xf32>
      %22 = vector.shape_cast %21 : vector<1xf32> to vector<1x1x1xf32>
      %23 = vector.extract %22[0, 0, 0] : f32 from vector<1x1x1xf32>
      %24 = vector.broadcast %23 : f32 to vector<1x1xf32>
      %25 = arith.subf %19, %24 : vector<1x1xf32>
      %cst_21 = arith.constant 9.99999993E-9 : f32
      %26 = vector.broadcast %cst_21 : f32 to vector<1x1xf32>
      %27 = arith.addf %25, %26 : vector<1x1xf32>
      %28 = tpu.reciprocal %27 : vector<1x1xf32> -> vector<1x1xf32>
      %29 = vector.broadcast %24 : vector<1x1xf32> to vector<16x16xf32>
      %30 = arith.subf %14, %29 : vector<16x16xf32>
      %31 = vector.broadcast %28 : vector<1x1xf32> to vector<16x16xf32>
      %32 = arith.mulf %30, %31 : vector<16x16xf32>
      %33 = arith.maximumf %32, %10 : vector<16x16xf32>
      %c0_22 = arith.constant 0 : index
      %c0_23 = arith.constant 0 : index
      %34 = vector.load %arg7[%c0_22, %c0_23] : memref<16x16xf32, #tpu.memory_space<vmem>>, vector<16x16xf32>
      tpu.vector_store %arg7[%c0_22, %c0_23], %33 {strides = array<i32>} : memref<16x16xf32, #tpu.memory_space<vmem>>, vector<16x16xf32>,
    } else {
    }
    %c0 = arith.constant 0 : index
    %c0_1 = arith.constant 0 : index
    %c0_2 = arith.constant 0 : index
    %c0_3 = arith.constant 0 : index
    %3 = vector.load %arg5[%c0, %c0_1, %c0_2, %c0_3] : memref<1x4x16x16xf32, #tpu.memory_space<vmem>>, vector<1x4x16x16xf32>
    %c0_4 = arith.constant 0 : index
    %c0_5 = arith.constant 0 : index
    %4 = vector.load %arg7[%c0_4, %c0_5] : memref<16x16xf32, #tpu.memory_space<vmem>>, vector<16x16xf32>
    %5 = vector.shape_cast %4 : vector<16x16xf32> to vector<1x1x16x16xf32>
    %6 = vector.broadcast %5 : vector<1x1x16x16xf32> to vector<1x4x16x16xf32>
    %7 = arith.mulf %3, %6 : vector<1x4x16x16xf32>
    %c0_6 = arith.constant 0 : index
    %c0_7 = arith.constant 0 : index
    %c0_8 = arith.constant 0 : index
    %c0_9 = arith.constant 0 : index
    %8 = vector.load %arg6[%c0_6, %c0_7, %c0_8, %c0_9] : memref<1x4x16x16xf32, #tpu.memory_space<vmem>>, vector<1x4x16x16xf32>
    tpu.vector_store %arg6[%c0_6, %c0_7, %c0_8, %c0_9], %7 {strides = array<i32>} : memref<1x4x16x16xf32, #tpu.memory_space<vmem>>, vector<1x4x16x16xf32>,
    return
  }
  func.func @transform_0(%arg0: i32, %arg1: i32) -> (i32, i32) {
    %c0_i32 = arith.constant 0 : i32
    %c0_i32_0 = arith.constant 0 : i32
    %c0_i32_1 = arith.constant 0 : i32
    return %c0_i32, %c0_i32_0 : i32, i32
  }
  func.func @transform_1(%arg0: i32, %arg1: i32) -> (i32, i32) {
    %c0_i32 = arith.constant 0 : i32
    %c0_i32_0 = arith.constant 0 : i32
    %c0_i32_1 = arith.constant 0 : i32
    return %c0_i32, %c0_i32_0 : i32, i32
  }
  func.func @transform_2(%arg0: i32, %arg1: i32) -> (i32, i32, i32, i32) {
    %c0_i32 = arith.constant 0 : i32
    %c0_i32_0 = arith.constant 0 : i32
    %c0_i32_1 = arith.constant 0 : i32
    %c0_i32_2 = arith.constant 0 : i32
    return %arg0, %c0_i32, %c0_i32_0, %c0_i32_1 : i32, i32, i32, i32
  }
  func.func @transform_3(%arg0: i32, %arg1: i32) -> (i32, i32, i32, i32) {
    %c0_i32 = arith.constant 0 : i32
    %c0_i32_0 = arith.constant 0 : i32
    %c0_i32_1 = arith.constant 0 : i32
    return %arg0, %arg1, %c0_i32, %c0_i32_0 : i32, i32, i32, i32
  }
  func.func @transform_4(%arg0: i32, %arg1: i32) -> (i32, i32, i32, i32) {
    %c0_i32 = arith.constant 0 : i32
    %c0_i32_0 = arith.constant 0 : i32
    %c0_i32_1 = arith.constant 0 : i32
    return %arg0, %arg1, %c0_i32, %c0_i32_0 : i32, i32, i32, i32
  }
}

</mosaic_0001>

<bundles_post_ra>
// kernel: tpu_custom_call.1
= control target key start
LH: loop header
LB: loop body
LE: loop exit
PB: predicated region body
PF: predicated region fallthrough
CT: control target
= control target key end

     0   :  { %s1313_s0 = inlined_call_operand.hbm [shape: f32[16,16], index: 0, kind: input, shape index: {}]   ;;  %s1314_s1 = inlined_call_operand.hbm [shape: f32[16,16], index: 1, kind: input, shape index: {}]   ;;  %s1315_s2 = inlined_call_operand.hbm [shape: f32[2,1,16,16], index: 2, kind: input, shape index: {}]   ;;  %s1316_s3 = inlined_call_operand.hbm [shape: f32[2,4,16,16], index: 3, kind: input, shape index: {}]   ;;  %s1317_s4 = inlined_call_operand.hbm [shape: f32[2,4,16,16], index: 4, kind: output, shape index: {}]  }
   0x1   :  { %1325 = sst [smem:[#allocation18_spill]] %s1313_s0 }
   0x2   :  { %1326 = sst [smem:[#allocation19_spill]] %s1317_s4 }
   0x3   :  { %9 = vsyncpa [#allocation4], 0 }
   0x4   :  { %10 = vsyncpa [#allocation7], 0 }
   0x5   :  { %11 = vsyncpa [#allocation5], 0 }
   0x6   :  { %13 = vsyncpa [#allocation5 + $0x1], 0  ;;  %s1063_s15 = smov 0   ;;  %s1065_s16 = smov 0  }
   0x7   :  { %s1067_s17 = smov 0   ;;  %s1069_s18 = smov 0  }
   0x8   :  { %s1071_s19 = smov 0   ;;  %s1073_s20 = smov 0  }
   0x9 LB: > { %1327 = sst [smem:[#allocation15_spill]] %s1007_s15  ;;  %s1094_s21 = sadd.s32 4294967295, %s1027_s20   ;;  %s1027_s20 = sphi %s1073_s20, %s19_s20   ;;  %s1023_s19 = sphi %s1071_s19, %s1355_s19   ;;  %s1019_s18 = sphi %s1069_s18, %s1354_s18   ;;  %s1015_s17 = sphi %s1067_s17, %s1353_s17   ;;  %s1011_s16 = sphi %s1065_s16, %s1352_s16   ;;  %s1007_s15 = sphi %s1063_s15, %s1351_s15  }
   0xa   : > { %s682_s22 = sadd.s32 4294967294, %s1027_s20   ;;  %p87_p0 = scmp.ne.s32.totalorder %s1015_s17, %s1011_s16 }
   0xb   : > { %p88_p1 = scmp.eq.s32.totalorder %s1027_s20, 0  ;;  %p93_p2 = scmp.ne.s32.totalorder %s1011_s16, %s1007_s15 }
   0xc   : > { %p1318_p3 = scmp.eq.s32.totalorder %s1094_s21, 0  ;;  %p147_p4 = scmp.eq.s32.totalorder %s1094_s21, 1 }
   0xd   : > { %p1105_p5 = por %p88_p1, %p87_p0  ;;  %p153_p6 = scmp.eq.s32.totalorder %s682_s22, 1 }
   0xe   : > { %p1111_p7 = por %p1318_p3, %p93_p2  ;;  %p1115_p8 = por %p147_p4, %p87_p0 }
   0xf   : > { %p1119_p9 = por %p153_p6, %p93_p2  ;;  %p683_p10 = scmp.ge.s32.totalorder %s1027_s20, 1 }
  0x10   : > { %s1330_s26 = scalar_select %p1115_p8, 1, 0 }
  0x11   : > { %s1332_s27 = scalar_select %p1119_p9, 1, 0 }
  0x12   : > { %1331 = sst [smem:[#allocation16_spill]] %s1330_s26  ;;  %p160_p11 = scmp.lt.s32.totalorder %s1027_s20, 3 }
  0x13   : > { %1333 = sst [smem:[#allocation17_spill]] %s1332_s27  ;;  %s1029_s29 = smov [#allocation3]  }
  0x14   : > { %p1125_p12 = pnand %p683_p10, %p160_p11  ;;  %s172_s30 = sshll.u32 %s1029_s29, 4  ;;  %s173_s30 = int_to_ptr.vmem [resolvable:$true] %s172_s30 }
  0x15   : > { %p771_p1 = scmp.lt.s32.totalorder %s1027_s20, 2  ;;  %s31_s7 = sadd.s32 1, %s1023_s19 }
  0x16   : > { %p751_p13 = pneg %p1125_p12  ;;  %p1146_p6 = scmp.ge.s32.totalorder %s31_s7, 2 }
  0x17   : > { %p1141_p2 = pnand %p771_p1, %p1105_p5  ;;  %s842_s9 = scalar_lea.vmem %s173_s30, 256 }
  0x18   : > { %p1135_p4 = pnand %p751_p13, %p1318_p3  ;;  %p843_p11 = scmp.ne.s32.totalorder %s173_s30, %s842_s9 }
  0x19   : > { %p850_p3 = scmp.lt.s32.totalorder %s173_s30, %s173_s30  ;;  %p851_p9 = scmp.lt.s32.totalorder %s842_s9, %s842_s9 }
  0x1a   : > { %p833_p10 = pneg %p1135_p4 }
  0x1b   : > { %p852_p8 = por %p851_p9, %p850_p3 }
  0x1c   : > { %p845_p13 = pnand %p843_p11, %p833_p10 }
  0x1e   : > { %p846_p0 = pneg %p845_p13 }
  0x20   : > { %p853_p5 = pnand %p852_p8, %p846_p0 }
  0x22   : > { %856 = shalt.err (!%p853_p5)
}
  0x23   : > { %s1030_s10 = smov 128   ;;  %s1031_s11 = smov 8  }
  0x24   : > { %s1338_s0 = sld [smem:[#allocation18_spill]]  ;;  %s199_s14 = sand.u32 1, %s1027_s20  }
  0x25   : > { %s1357_s7 = smov (%p1146_p6, %s31_s7), 0  ;;  %s201_s22 = sand.u32 1, %s1015_s17  }
  0x26   : > { %s77_s24 = ssub.s32 %s1023_s19, %s1357_s7  ;;  %s687_s29 = sshll.u32 %s201_s22, 4 }
  0x27   : > { %p78_p3 = scmp.eq.s32.totalorder %s77_s24, 0  ;;  %s708_s9 = sshll.u32 %s1023_s19, 8 }
  0x28   : > { %s203_s23 = scalar_lea.vmem [#allocation8], %s687_s29  ;;  %s1339_s15 = sadd.s32 1, %s1015_s17 }
  0x29   : > { %s210_s27 = sshll.u32 %s203_s23, 4  ;;  %s1182_s8 = scalar_lea.sflag [#allocation4], %s199_s14  ;;  %s211_s27 = int_to_ptr.vmem [resolvable:$true] %s210_s27 }
  0x2a   : > { %754 = dma.hbm_to_vmem [thread:$0]  (!%p1135_p4), %s1338_s0, 256, %s173_s30, [#allocation4], %s1030_s10, %s1030_s10, %s1031_s11  }
  0x2b   : > { %s1177_s26 = scalar_select %p78_p3, %s1015_s17, %s1339_s15  }
  0x2c   : > { %s209_s30 = scalar_lea.hbm %s1315_s2, %s708_s9  ;;  %p859_p8 = pneg %p1141_p2 }
  0x2d   : > { %s870_s13 = scalar_lea.vmem %s211_s27, 256  ;;  %s1032_s24 = smov [#allocation8]  }
  0x2e   : > { %p871_p9 = scmp.ne.s32.totalorder %s211_s27, %s870_s13  ;;  %s875_s23 = sshll.u32 %s1032_s24, 4  ;;  %s876_s23 = int_to_ptr.vmem [resolvable:$false] %s875_s23 }
  0x2f   : > { %s877_s15 = scalar_lea.vmem %s876_s23, 512  ;;  %p878_p6 = scmp.lt.s32.totalorder %s211_s27, %s876_s23 }
  0x30   : > { %p873_p0 = pnand %p871_p9, %p859_p8  ;;  %p879_p11 = scmp.lt.s32.totalorder %s877_s15, %s870_s13 }
  0x32   : > { %p874_p1 = pneg %p873_p0  ;;  %p880_p13 = por %p879_p11, %p878_p6 }
  0x34   : > { %p881_p5 = pnand %p880_p13, %p874_p1 }
  0x36   : > { %884 = shalt.err (!%p881_p5)
}
  0x37   : > { %761 = dma.hbm_to_vmem [thread:$0]  (!%p1141_p2), %s209_s30, 256, %s211_s27, %s1182_s8, %s1030_s10, %s1030_s10, %s1031_s11  }
  0x38   : > { %s690_s4 = sshll.u32 %s201_s22, 6  ;;  %s1033_s14 = smov [#allocation6]  }
  0x39   : > { %s185_s29 = sshll.u32 %s1033_s14, 4  ;;  %s709_s9 = sshll.u32 %s1023_s19, 10  ;;  %s186_s29 = int_to_ptr.vmem [resolvable:$true] %s185_s29 }
  0x3a   : > { %s896_s12 = scalar_lea.vmem %s186_s29, 256  ;;  %p904_p1 = scmp.lt.s32.totalorder %s186_s29, %s186_s29 }
  0x3b   : > { %p897_p3 = scmp.ne.s32.totalorder %s186_s29, %s896_s12  ;;  %p905_p6 = scmp.lt.s32.totalorder %s896_s12, %s896_s12 }
  0x3d   : > { %p899_p9 = pnand %p897_p3, %p833_p10  ;;  %p906_p11 = por %p905_p6, %p904_p1 }
  0x3f   : > { %p900_p0 = pneg %p899_p9 }
  0x41   : > { %p907_p13 = pnand %p906_p11, %p900_p0 }
  0x43   : > { %910 = shalt.err (!%p907_p13)
}
  0x44   : > { %757 = dma.hbm_to_vmem [thread:$0]  (!%p1135_p4), %s1314_s1, 256, %s186_s29, [#allocation7], %s1030_s10, %s1030_s10, %s1031_s11  }
  0x45   : > { %s233_s24 = scalar_lea.hbm %s1316_s3, %s709_s9  ;;  %s224_s23 = scalar_lea.vmem [#allocation9], %s690_s4 }
  0x46   : > { %s234_s15 = sshll.u32 %s224_s23, 4  ;;  %s1034_s5 = smov [#allocation9]   ;;  %s235_s15 = int_to_ptr.vmem [resolvable:$true] %s234_s15 }
  0x47   : > { %s924_s14 = scalar_lea.vmem %s235_s15, 1024  ;;  %s929_s12 = sshll.u32 %s1034_s5, 4  ;;  %s930_s12 = int_to_ptr.vmem [resolvable:$false] %s929_s12 }
  0x48   : > { %p925_p10 = scmp.ne.s32.totalorder %s235_s15, %s924_s14  ;;  %s931_s0 = scalar_lea.vmem %s930_s12, 2048 }
  0x49   : > { %p932_p9 = scmp.lt.s32.totalorder %s235_s15, %s930_s12  ;;  %p933_p0 = scmp.lt.s32.totalorder %s931_s0, %s924_s14 }
  0x4a   : > { %p927_p5 = pnand %p925_p10, %p859_p8 }
  0x4b   : > { %p934_p4 = por %p933_p0, %p932_p9 }
  0x4c   : > { %p928_p3 = pneg %p927_p5 }
  0x4e   : > { %p935_p1 = pnand %p934_p4, %p928_p3 }
  0x50   : > { %938 = shalt.err (!%p935_p1)
}
  0x51   : > { %764 = dma.hbm_to_vmem [thread:$0]  (!%p1141_p2), %s233_s24, 1024, %s235_s15, %s1182_s8, %s1030_s10, %s1030_s10, %s1031_s11  }
  0x52   : > { %246 = sbr.rel (%p1125_p12) target bundleno = 750 (0x2ee), region = 36  ;;  %p1340_p8 = scmp.eq.s32.totalorder (!%p1125_p12), %s1094_s21, 0 }
  0x57   : > { %990 = dma.done.wait (%p1340_p8), [#allocation4], 256   ;;  %p1341_p6 = pmov %p1340_p8 }
  0x59   : > { %992 = vsyncadd (%p1341_p6), [#allocation4], 4294967040  ;;  %p1342_p11 = pmov %p1341_p6 }
  0x5a   : > { %p1343_p13 = pmov %p1341_p6 }
  0x5b   : > { %994 = dma.done.wait (%p1342_p11), [#allocation7], 256  }
  0x5c   : > { %996 = vsyncadd (%p1343_p13), [#allocation7], 4294967040  ;;  %s256_s0 = sand.u32 1, %s1094_s21   ;;  %s1233_s6 = sand.u32 1, %s1011_s16  }
  0x5d   : > { %s696_s28 = sshll.u32 %s1233_s6, 4  ;;  %s257_s10 = scalar_lea.sflag [#allocation4], %s256_s0 }
  0x5e   : > { %s260_s11 = scalar_lea.vmem [#allocation8], %s696_s28 }
  0x5f   : > { %998 = dma.done.wait (%p1111_p7), %s257_s10, 1280  }
  0x60   : > { %1000 = vsyncadd (%p1111_p7), %s257_s10, 4294966016  ;;  %vm311_vm0 = vcmask 130048   ;;  %v310_v0 = vld [vmem:[#allocation6 + $0x8] sm:$0xff]  ;;  %v309_v1 = vld [vmem:[#allocation6] sm:$0xff]  ;;  %s697_s8 = sshll.u32 %s1233_s6, 6  ;;  %s710_s29 = sshll.u32 %s1019_s18, 10 }
  0x61   : > { %v305_v2 = vld [vmem:[%s260_s11] sm:$0xff]  ;;  %719 = vmatprep.subr.mxu0 %v310_v0  ;;  %v306_v3 = vld [vmem:[%s260_s11 + $0x8] sm:$0xff]  ;;  %s269_s4 = scalar_lea.vmem [#allocation9], %s697_s8  ;;  %s298_s9 = scalar_lea.vmem [#allocation10], %s697_s8 }
  0x62   : > { %723 = vmatprep.mubr.msk.f32.mxu0 %vm311_vm0, %v305_v2  ;;  %720 = vmatpush3.msra.mxu0 %v310_v0  ;;  %v307_v4 = vld [vmem:[#allocation3] sm:$0xff]  ;;  %v308_v7 = vld [vmem:[#allocation3 + $0x8] sm:$0xff]  ;;  %v513_v43 = vld [vmem:[%s269_s4 + $0x10] sm:$0xff]  ;;  %s555_s27 = sshll.u32 %s298_s9, 4  ;;  %s1344_s13 = sld [smem:[#allocation19_spill]]  ;;  %s1257_s27 = int_to_ptr.vmem [resolvable:$true] %s555_s27 }
  0x63   : > { %721 = vmatprep.subr.mxu0 %v309_v1  ;;  %730 = vmatprep.mubr.msk.f32.mxu1 %vm311_vm0, %v307_v4  ;;  %v511_v41 = vld [vmem:[%s269_s4] sm:$0xff]  ;;  %v512_v42 = vld [vmem:[%s269_s4 + $0x8] sm:$0xff]  ;;  %v514_v44 = vld [vmem:[%s269_s4 + $0x18] sm:$0xff]  ;;  %s1345_s18 = sld [smem:[#allocation16_spill]]  ;;  %s539_s23 = scalar_lea.sflag [#allocation5], %s1233_s6 }
  0x64   : > { %722 = vmatpush3.msra.mxu0 %v309_v1  ;;  %v515_v45 = vld [vmem:[%s269_s4 + $0x20] sm:$0xff]  ;;  %v516_v46 = vld [vmem:[%s269_s4 + $0x28] sm:$0xff]  ;;  %v517_v47 = vld [vmem:[%s269_s4 + $0x30] sm:$0xff]  ;;  %s939_s15 = scalar_lea.vmem %s1257_s27, 1024  ;;  %s1035_s14 = smov [#allocation10]  }
  0x65   : > { %724 = vmatmul.mubr.msk.f32.vlgmr.msra.gmra.mxu0 %vm311_vm0, %v306_v3  ;;  %v518_v48 = vld [vmem:[%s269_s4 + $0x38] sm:$0xff]  ;;  %p940_p7 = scmp.ne.s32.totalorder %s1257_s27, %s939_s15  ;;  %s943_s5 = sshll.u32 %s1035_s14, 4  ;;  %s944_s5 = int_to_ptr.vmem [resolvable:$false] %s943_s5 }
  0x66   : > { %s945_s12 = scalar_lea.vmem %s944_s5, 2048  ;;  %p946_p5 = scmp.lt.s32.totalorder %s1257_s27, %s944_s5 }
  0x67   : > { %p947_p3 = scmp.lt.s32.totalorder %s945_s12, %s939_s15 }
  0x68   : > { %s1255_s24 = scalar_lea.hbm %s1344_s13, %s710_s29 }
  0x69   : > { %p1346_p12 = scmp.ne.s32.totalorder %s1345_s18, 0  ;;  %p948_p9 = por %p947_p3, %p946_p5 }
  0x6b   : > { %p941_p2 = pnand %p940_p7, %p1346_p12 }
  0x6d   : > { %p942_p10 = pneg %p941_p2 }
  0x6f   : > { %p949_p0 = pnand %p948_p9, %p942_p10 }
 0x125   : > { %v725_v5 = vpop.f32.mrf.mxu0 }
 0x126   : > { %726 = vmatprep.subr.mxu1 %v725_v5 }
 0x127   : > { %v384_v6 = vpop.f32.mrf.mxu0  ;;  %727 = vmatpush3.msra.mxu1 %v725_v5 }
 0x128   : > { %728 = vmatprep.subr.mxu1 %v384_v6 }
 0x129   : > { %729 = vmatpush3.msra.mxu1 %v384_v6 }
 0x12a   : > { %731 = vmatmul.mubr.msk.f32.vlgmr.msra.gmra.mxu1 %vm311_vm0, %v308_v7 }
 0x1ea   : > { %v732_v8 = vpop.f32.mrf.mxu1 }
 0x1eb   : > { %v475_v11 = vsel %vm311_vm0, %v732_v8, -inf  ;;  %v488_v14 = vsel %vm311_vm0, %v732_v8, inf }
 0x1ec   : > { %v465_v9 = vpop.f32.mrf.mxu1 }
 0x1ed   : > { %v474_v10 = vsel %vm311_vm0, %v465_v9, -inf  ;;  %v487_v13 = vsel %vm311_vm0, %v465_v9, inf }
 0x1ee   : > { %v476_v12 = vmax.f32 %v474_v10, %v475_v11  ;;  %v489_v15 = vmin.f32 %v487_v13, %v488_v14 }
 0x1f0   : > { %477 = vmax.xlane.f32.xlu0 %v476_v12 }
 0x1f4   : > { %490 = vmin.xlane.f32.xlu0 %v489_v15 }
 0x279   : > { %v478_v16 = vpop.xlane.xlu0 %477 }
 0x27a   : > { %v479_v17 = vrot.slane %v478_v16, 4 }
 0x27c   : > { %v480_v18 = vmax.f32 %v478_v16, %v479_v17 }
 0x27d   : > { %v491_v19 = vpop.xlane.xlu0 %490 }
 0x27e   : > { %v481_v20 = vrot.slane %v480_v18, 2  ;;  %v492_v21 = vrot.slane %v491_v19, 4 }
 0x280   : > { %v493_v22 = vmin.f32 %v491_v19, %v492_v21  ;;  %v482_v23 = vmax.f32 %v480_v18, %v481_v20 }
 0x282   : > { %v494_v24 = vrot.slane %v493_v22, 2  ;;  %v483_v25 = vrot.slane %v482_v23, 1 }
 0x284   : > { %v495_v26 = vmin.f32 %v493_v22, %v494_v24  ;;  %v484_v27 = vmax.f32 %v482_v23, %v483_v25 }
 0x286   : > { %733 = vpush %v484_v27  ;;  %v496_v28 = vrot.slane %v495_v26, 1 }
 0x288   : > { %v497_v29 = vmin.f32 %v495_v26, %v496_v28 }
 0x28a   : > { %735 = vpush %v497_v29 }
 0x2b7   : > { %s734_s21 = spop %733 }
 0x2b8   : > { %v486_v30 = vstv %s734_s21 }
 0x2bb   : > { %s736_s25 = spop %735 }
 0x2bc   : > { %v499_v31 = vstv %s736_s25 }
 0x2bd   : > { %v500_v32 = vsub.f32 %v486_v30, %v499_v31  ;;  %v503_v34 = vsub.f32 %v465_v9, %v499_v31  ;;  %v504_v35 = vsub.f32 %v732_v8, %v499_v31 }
 0x2bf   : > { %v501_v33 = vadd.f32 1e-08, %v500_v32 }
 0x2c1   : > { %829 = vrcp.f32 %v501_v33 }
 0x2ce   : > { %v830_v36 = vpop.eup %829 }
 0x2cf   : > { %v505_v37 = vmul.f32 %v830_v36, %v503_v34  ;;  %v506_v38 = vmul.f32 %v830_v36, %v504_v35 }
 0x2d1   : > { %v507_v39 = vmax.f32 %v505_v37, %v305_v2  ;;  %v508_v40 = vmax.f32 %v506_v38, %v306_v3 }
 0x2d3   : > { %509 = vst.msk [vmem:[#allocation2] sm:$0xff] %vm311_vm0, %v507_v39  ;;  %510 = vst.msk [vmem:[#allocation2 + $0x8] sm:$0xff] %vm311_vm0, %v508_v40 }
 0x2da   : > { %v519_v49 = vld [vmem:[#allocation2] sm:$0xff]  ;;  %v520_v50 = vld [vmem:[#allocation2 + $0x8] sm:$0xff] }
 0x2db   : > { %v521_v51 = vmul.f32 %v519_v49, %v511_v41  ;;  %v522_v52 = vmul.f32 %v520_v50, %v512_v42  ;;  %v523_v53 = vmul.f32 %v519_v49, %v513_v43  ;;  %v524_v54 = vmul.f32 %v520_v50, %v514_v44 }
 0x2dc   : > { %v525_v55 = vmul.f32 %v519_v49, %v515_v45  ;;  %v526_v56 = vmul.f32 %v520_v50, %v516_v46  ;;  %v527_v57 = vmul.f32 %v519_v49, %v517_v47  ;;  %v528_v58 = vmul.f32 %v520_v50, %v518_v48 }
 0x2dd   : > { %530 = vst.msk [vmem:[%s298_s9] sm:$0xff] %vm311_vm0, %v521_v51  ;;  %531 = vst.msk [vmem:[%s298_s9 + $0x8] sm:$0xff] %vm311_vm0, %v522_v52 }
 0x2de   : > { %532 = vst.msk [vmem:[%s298_s9 + $0x10] sm:$0xff] %vm311_vm0, %v523_v53  ;;  %533 = vst.msk [vmem:[%s298_s9 + $0x18] sm:$0xff] %vm311_vm0, %v524_v54 }
 0x2df   : > { %534 = vst.msk [vmem:[%s298_s9 + $0x20] sm:$0xff] %vm311_vm0, %v525_v55  ;;  %535 = vst.msk [vmem:[%s298_s9 + $0x28] sm:$0xff] %vm311_vm0, %v526_v56 }
 0x2e0   : > { %536 = vst.msk [vmem:[%s298_s9 + $0x30] sm:$0xff] %vm311_vm0, %v527_v57  ;;  %537 = vst.msk [vmem:[%s298_s9 + $0x38] sm:$0xff] %vm311_vm0, %v528_v58 }
 0x2e1   : > { %952 = shalt.err (!%p949_p0)
}
 0x2e2   : > { %s953_s0 = scalar_lea.hbm %s1255_s24, 1024  ;;  %s957_s11 = scalar_lea.hbm %s1344_s13, 2048 }
 0x2e3   : > { %p954_p4 = scmp.ne.s32.totalorder %s1255_s24, %s953_s0  ;;  %p958_p6 = scmp.lt.s32.totalorder %s1255_s24, %s1344_s13 }
 0x2e4   : > { %p959_p11 = scmp.lt.s32.totalorder %s957_s11, %s953_s0 }
 0x2e5   : > { %p955_p1 = pnand %p954_p4, %p1346_p12 }
 0x2e6   : > { %p960_p13 = por %p959_p11, %p958_p6 }
 0x2e7   : > { %p956_p8 = pneg %p955_p1 }
 0x2e9   : > { %p961_p7 = pnand %p960_p13, %p956_p8 }
 0x2eb   : > { %964 = shalt.err (!%p961_p7)
}
 0x2ec   : > { %s1036_s8 = smov 128   ;;  %s1037_s4 = smov 8  }
 0x2ed   : > { %749 = dma.vmem_to_hbm [thread:$0]  (%p1346_p12), %s1257_s27, 1024, %s1255_s24, %s539_s23, %s1036_s8, %s1036_s8, %s1037_s4  }
 0x2ee PF: > { %s1347_s29 = sld [smem:[#allocation15_spill]]  ;;  %p1350_p10 = scmp.ge.s32.totalorder %s1027_s20, 2 }
 0x2ef   : > { %s1348_s9 = sld [smem:[#allocation17_spill]] }
 0x2f4   : > { %s570_s22 = sand.u32 1, %s1347_s29  }
 0x2f5   : > { %p1349_p2 = scmp.ne.s32.totalorder %s1348_s9, 0  ;;  %s571_s30 = scalar_lea.sflag [#allocation5], %s570_s22 }
 0x2f7   : > { %p766_p5 = pnand %p1350_p10, %p1349_p2 }
 0x2f9   : > { %p767_p3 = pneg %p766_p5 }
 0x2fb   : > { %1002 = dma.done.wait (%p767_p3), %s571_s30, 1024  }
 0x2fc   : > { %1004 = vsyncadd (%p767_p3), %s571_s30, 4294966272  ;;  %s19_s20 = sadd.s32 1, %s1027_s20   ;;  %s1351_s15 = smov %s1011_s16 }
 0x2fd   : > { %p16_p9 = scmp.ge.s32.totalorder %s19_s20, 4   ;;  %s1352_s16 = smov %s1015_s17 }
 0x2fe   : > { %s1353_s17 = smov %s1177_s26  ;;  %s1354_s18 = smov %s1023_s19 }
 0x2ff   : > { %s1355_s19 = smov %s1357_s7  ;;  %18 = sbr.rel (!%p16_p9) target bundleno = 9 (0x9), region = 103 }
 0x304   :  { %576 = vsyncpa [#allocation4], 1 }
 0x305   :  { %578 = vsyncpa [#allocation4 + $0x1], 1 }
 0x306   :  { %579 = vsyncpa [#allocation7], 1 }
 0x307   :  { %580 = vsyncpa [#allocation5], 1 }
 0x308   :  { %582 = vsyncpa [#allocation5 + $0x1], 1 }

</bundles_post_ra>
